<compile_context>
chip_gen: v7x
topology: tpu7x:2x2x1
jax: 0.10.0
libtpu: 0.0.40
codegen_flags: <defaults>
</compile_context>

<pallas_src>
import jax
import jax.numpy as jnp
from jax import lax
from jax.experimental import pallas as pl
from jax.experimental.pallas import tpu as pltpu

IN_FEATURES = 4
HIDDEN = 128
N_ACTIONS = 2
OUT_W = 128            # lane-dense output slab width
VALUE_COL = N_ACTIONS  # column 2 of the output slab carries the state value


def policy_kernel(x_ref, small_ref, w_heads_ref, out_ref):
    """Fused Policy forward.

    x_ref       : (TB, 4)    observations
    small_ref   : (8, 128)   rows 0..3 = affine1 weight rows, row 4 = affine1 bias,
                             row 5 = fused head bias (cols 0:2 action, col 2 value)
    w_heads_ref : (128, 128) fused head weight, cols 0:2 = action_head, col 2 = value_head
    out_ref     : (TB, 128)  cols 0:2 = softmax probs, col 2 = value, rest zero
    """
    x = x_ref[...]                                           # (TB, 4) f32
    tb = x.shape[0]

    # --- affine1 on the VPU (K=4 is far too small for the MXU) -----------
    # h = b1 + sum_k x[:, k] * W1[k, :]
    h = jnp.broadcast_to(small_ref[4:5, :], (tb, HIDDEN))
    for k in range(IN_FEATURES):
        h = h + x[:, k:k + 1] * small_ref[k:k + 1, :]

    # dropout(p=0.5) in eval mode is the identity.
    # TODO(synk): training-mode dropout not implemented.
    h = jnp.maximum(h, 0.0)                                  # ReLU, (TB, 128)

    # --- fused action/value heads: one lane-dense MXU matmul -------------
    head = jnp.dot(h, w_heads_ref[...], preferred_element_type=jnp.float32)
    head = head + small_ref[5:6, :]                          # cols 0,1 = logits, col 2 = value

    # --- 2-class softmax as a sigmoid of the logit difference ------------
    d = head[:, 1:2] - head[:, 0:1]                          # (TB, 1)
    p1 = 1.0 / (1.0 + jnp.exp(-d))                           # softmax(logits)[:, 1]
    p0 = 1.0 - p1                                            # softmax(logits)[:, 0]

    # --- assemble one lane-dense (TB, 128) output slab (unmasked store) ---
    col = lax.broadcasted_iota(jnp.int32, head.shape, dimension=1)
    out_ref[...] = jnp.where(col == 0, p0, jnp.where(col == 1, p1, head))


def _round_up(n, m):
    return ((n + m - 1) // m) * m


def policy_forward(x, packed_params, *, block_b=128):
    """Runs the fused Policy forward. Returns (probs (B, 2), value (B, 1))."""
    small_pack, w_heads = packed_params
    B = x.shape[0]

    # Pad the batch to a sublane-aligned multiple of the batch tile.
    tb = min(block_b, _round_up(B, 8))
    b_pad = _round_up(B, tb)
    if b_pad != B:
        x = jnp.pad(x, ((0, b_pad - B), (0, 0)))

    out = pl.pallas_call(
        policy_kernel,
        out_shape=jax.ShapeDtypeStruct((b_pad, OUT_W), jnp.float32),
        grid_spec=pltpu.PrefetchScalarGridSpec(
            num_scalar_prefetch=0,
            grid=(b_pad // tb,),
            in_specs=[
                pl.BlockSpec((tb, IN_FEATURES), lambda i: (i, 0)),
                pl.BlockSpec((8, HIDDEN), lambda i: (0, 0)),
                pl.BlockSpec((HIDDEN, OUT_W), lambda i: (0, 0)),
            ],
            out_specs=pl.BlockSpec((tb, OUT_W), lambda i: (i, 0)),
        ),
        compiler_params=pltpu.CompilerParams(
            dimension_semantics=("parallel",)),
    )(x, small_pack, w_heads)

    probs = out[:B, :N_ACTIONS]
    value = out[:B, VALUE_COL:VALUE_COL + 1]
    return probs, value


def pack_params(w1, b1, wa, ba, wv, bv):
    """Packs all parameters into two lane-dense VMEM inputs.

    Weights are stored pre-transposed as [in_features, out_features] so the
    kernel computes x @ W + b (matches PyTorch's x @ W.T + b).
    """
    head_bias = jnp.zeros((OUT_W,), jnp.float32)
    head_bias = head_bias.at[:N_ACTIONS].set(ba).at[VALUE_COL].set(bv[0])

    small_pack = jnp.zeros((8, HIDDEN), jnp.float32)
    small_pack = small_pack.at[0:IN_FEATURES, :].set(w1)
    small_pack = small_pack.at[IN_FEATURES, :].set(b1)
    small_pack = small_pack.at[IN_FEATURES + 1, :].set(head_bias)

    w_heads = jnp.zeros((HIDDEN, OUT_W), jnp.float32)
    w_heads = w_heads.at[:, :N_ACTIONS].set(wa)
    w_heads = w_heads.at[:, VALUE_COL].set(wv[:, 0])
    return small_pack, w_heads


def init_raw_params(key):
    """Deterministic init mimicking nn.Linear's U(-1/sqrt(fan_in), 1/sqrt(fan_in))."""
    def linear(k, fan_in, fan_out):
        kw, kb = jax.random.split(k)
        bound = 1.0 / jnp.sqrt(float(fan_in))
        w = jax.random.uniform(kw, (fan_in, fan_out), jnp.float32, -bound, bound)
        b = jax.random.uniform(kb, (fan_out,), jnp.float32, -bound, bound)
        return w, b

    k1, k2, k3 = jax.random.split(key, 3)
    w1, b1 = linear(k1, IN_FEATURES, HIDDEN)   # affine1
    wa, ba = linear(k2, HIDDEN, N_ACTIONS)     # action_head
    wv, bv = linear(k3, HIDDEN, 1)             # value_head
    return w1, b1, wa, ba, wv, bv


def policy_reference(x, w1, b1, wa, ba, wv, bv):
    """Pure-JAX reference matching the PyTorch module in eval mode."""
    h = jnp.maximum(x @ w1 + b1, 0.0)
    probs = jax.nn.softmax(h @ wa + ba, axis=-1)
    value = h @ wv + bv
    return probs, value


if __name__ == "__main__":
    key = jax.random.PRNGKey(0)
    k_params, k_x = jax.random.split(key)

    raw = init_raw_params(k_params)
    packed = pack_params(*raw)

    # CartPole observation: 4 features; small batch of 2.
    x = jax.random.normal(k_x, (2, IN_FEATURES), jnp.float32)

    probs, value = policy_forward(x, packed)
    jax.block_until_ready((probs, value))

    # sanity: shapes, softmax rows sum to 1, and match the pure-JAX reference
    assert probs.shape == (2, N_ACTIONS) and value.shape == (2, 1)
    assert jnp.allclose(jnp.sum(probs, axis=1), 1.0, atol=1e-5)
    ref_probs, ref_value = policy_reference(x, *raw)
    assert jnp.allclose(probs, ref_probs, atol=1e-5)
    assert jnp.allclose(value, ref_value, atol=1e-5)

    print("KERNEL_OK")
</pallas_src>

<mosaic_0001>
module attributes {stable_mosaic.version = 11 : i64} {
  func.func @policy_kernel(%arg0: i32, %arg1: memref<8x4xf32, #tpu.memory_space<vmem>>, %arg2: memref<8x128xf32, #tpu.memory_space<vmem>>, %arg3: memref<128x128xf32, #tpu.memory_space<vmem>>, %arg4: memref<8x128xf32, #tpu.memory_space<vmem>>) attributes {dimension_semantics = [#tpu.dimension_semantics<parallel>], iteration_bounds = array<i64: 1>, scalar_prefetch = 0 : i64, scratch_operands = 0 : i64, tpu.core_type = #tpu.core_type<tc>, window_params = [{transform_indices = @transform_0, window_bounds = array<i64: 8, 4>}, {pipeline_mode = #tpu.pipeline_mode<synchronous>, transform_indices = @transform_1, window_bounds = array<i64: 8, 128>}, {pipeline_mode = #tpu.pipeline_mode<synchronous>, transform_indices = @transform_2, window_bounds = array<i64: 128, 128>}, {transform_indices = @transform_3, window_bounds = array<i64: 8, 128>}]} {
    %c0 = arith.constant 0 : index
    %c0_0 = arith.constant 0 : index
    %0 = vector.load %arg1[%c0, %c0_0] : memref<8x4xf32, #tpu.memory_space<vmem>>, vector<8x4xf32>
    %c4 = arith.constant 4 : index
    %c0_1 = arith.constant 0 : index
    %1 = vector.load %arg2[%c4, %c0_1] : memref<8x128xf32, #tpu.memory_space<vmem>>, vector<1x128xf32>
    %2 = vector.shape_cast %1 : vector<1x128xf32> to vector<1x128xf32>
    %3 = vector.broadcast %2 : vector<1x128xf32> to vector<8x128xf32>
    %4 = vector.extract_strided_slice %0 {offsets = [0, 0], sizes = [8, 1], strides = [1, 1]} : vector<8x4xf32> to vector<8x1xf32>
    %c0_2 = arith.constant 0 : index
    %c0_3 = arith.constant 0 : index
    %5 = vector.load %arg2[%c0_2, %c0_3] : memref<8x128xf32, #tpu.memory_space<vmem>>, vector<1x128xf32>
    %6 = vector.broadcast %4 : vector<8x1xf32> to vector<8x128xf32>
    %7 = vector.broadcast %5 : vector<1x128xf32> to vector<8x128xf32>
    %8 = arith.mulf %6, %7 : vector<8x128xf32>
    %9 = arith.addf %3, %8 : vector<8x128xf32>
    %10 = vector.extract_strided_slice %0 {offsets = [0, 1], sizes = [8, 1], strides = [1, 1]} : vector<8x4xf32> to vector<8x1xf32>
    %c1 = arith.constant 1 : index
    %c0_4 = arith.constant 0 : index
    %11 = vector.load %arg2[%c1, %c0_4] : memref<8x128xf32, #tpu.memory_space<vmem>>, vector<1x128xf32>
    %12 = vector.broadcast %10 : vector<8x1xf32> to vector<8x128xf32>
    %13 = vector.broadcast %11 : vector<1x128xf32> to vector<8x128xf32>
    %14 = arith.mulf %12, %13 : vector<8x128xf32>
    %15 = arith.addf %9, %14 : vector<8x128xf32>
    %16 = vector.extract_strided_slice %0 {offsets = [0, 2], sizes = [8, 1], strides = [1, 1]} : vector<8x4xf32> to vector<8x1xf32>
    %c2 = arith.constant 2 : index
    %c0_5 = arith.constant 0 : index
    %17 = vector.load %arg2[%c2, %c0_5] : memref<8x128xf32, #tpu.memory_space<vmem>>, vector<1x128xf32>
    %18 = vector.broadcast %16 : vector<8x1xf32> to vector<8x128xf32>
    %19 = vector.broadcast %17 : vector<1x128xf32> to vector<8x128xf32>
    %20 = arith.mulf %18, %19 : vector<8x128xf32>
    %21 = arith.addf %15, %20 : vector<8x128xf32>
    %22 = vector.extract_strided_slice %0 {offsets = [0, 3], sizes = [8, 1], strides = [1, 1]} : vector<8x4xf32> to vector<8x1xf32>
    %c3 = arith.constant 3 : index
    %c0_6 = arith.constant 0 : index
    %23 = vector.load %arg2[%c3, %c0_6] : memref<8x128xf32, #tpu.memory_space<vmem>>, vector<1x128xf32>
    %24 = vector.broadcast %22 : vector<8x1xf32> to vector<8x128xf32>
    %25 = vector.broadcast %23 : vector<1x128xf32> to vector<8x128xf32>
    %26 = arith.mulf %24, %25 : vector<8x128xf32>
    %27 = arith.addf %21, %26 : vector<8x128xf32>
    %cst = arith.constant 0.000000e+00 : f32
    %28 = vector.broadcast %cst : f32 to vector<8x128xf32>
    %29 = arith.maximumf %27, %28 : vector<8x128xf32>
    %c0_7 = arith.constant 0 : index
    %c0_8 = arith.constant 0 : index
    %30 = vector.load %arg3[%c0_7, %c0_8] : memref<128x128xf32, #tpu.memory_space<vmem>>, vector<128x128xf32>
    %cst_9 = arith.constant dense<0.000000e+00> : vector<8x128xf32>
    %31 = tpu.matmul %29, %30, %cst_9 {dimension_numbers = #tpu.dot_dimension_numbers<[1], [0], [0], [1], [0, 0, 1, 1], [], []>} : vector<8x128xf32>, vector<128x128xf32>, vector<8x128xf32> -> vector<8x128xf32>
    %c5 = arith.constant 5 : index
    %c0_10 = arith.constant 0 : index
    %32 = vector.load %arg2[%c5, %c0_10] : memref<8x128xf32, #tpu.memory_space<vmem>>, vector<1x128xf32>
    %33 = vector.broadcast %32 : vector<1x128xf32> to vector<8x128xf32>
    %34 = arith.addf %31, %33 : vector<8x128xf32>
    %35 = vector.extract_strided_slice %34 {offsets = [0, 1], sizes = [8, 1], strides = [1, 1]} : vector<8x128xf32> to vector<8x1xf32>
    %36 = vector.extract_strided_slice %34 {offsets = [0, 0], sizes = [8, 1], strides = [1, 1]} : vector<8x128xf32> to vector<8x1xf32>
    %37 = arith.subf %35, %36 : vector<8x1xf32>
    %cst_11 = arith.constant 0.000000e+00 : f32
    %38 = vector.broadcast %cst_11 : f32 to vector<8x1xf32>
    %39 = arith.subf %38, %37 : vector<8x1xf32>
    %40 = math.exp %39 : vector<8x1xf32>
    %cst_12 = arith.constant 1.000000e+00 : f32
    %41 = vector.broadcast %cst_12 : f32 to vector<8x1xf32>
    %42 = arith.addf %41, %40 : vector<8x1xf32>
    %cst_13 = arith.constant 1.000000e+00 : f32
    %43 = vector.broadcast %cst_13 : f32 to vector<8x1xf32>
    %44 = arith.divf %43, %42 : vector<8x1xf32>
    %cst_14 = arith.constant 1.000000e+00 : f32
    %45 = vector.broadcast %cst_14 : f32 to vector<8x1xf32>
    %46 = arith.subf %45, %44 : vector<8x1xf32>
    %47 = tpu.iota {dimensions = array<i32: 1>} : vector<8x128xi32>
    %c0_i32 = arith.constant 0 : i32
    %48 = vector.broadcast %c0_i32 : i32 to vector<8x128xi32>
    %49 = arith.cmpi eq, %47, %48 : vector<8x128xi32>
    %c1_i32 = arith.constant 1 : i32
    %50 = vector.broadcast %c1_i32 : i32 to vector<8x128xi32>
    %51 = arith.cmpi eq, %47, %50 : vector<8x128xi32>
    %52 = vector.shape_cast %44 : vector<8x1xf32> to vector<8x1xf32>
    %53 = vector.broadcast %52 : vector<8x1xf32> to vector<8x128xf32>
    %54 = arith.select %51, %53, %34 : vector<8x128xi1>, vector<8x128xf32>
    %55 = vector.shape_cast %46 : vector<8x1xf32> to vector<8x1xf32>
    %56 = vector.broadcast %55 : vector<8x1xf32> to vector<8x128xf32>
    %57 = arith.select %49, %56, %54 : vector<8x128xi1>, vector<8x128xf32>
    %c0_15 = arith.constant 0 : index
    %c0_16 = arith.constant 0 : index
    %58 = vector.load %arg4[%c0_15, %c0_16] : memref<8x128xf32, #tpu.memory_space<vmem>>, vector<8x128xf32>
    tpu.vector_store %arg4[%c0_15, %c0_16], %57 {strides = array<i32>} : memref<8x128xf32, #tpu.memory_space<vmem>>, vector<8x128xf32>,
    return
  }
  func.func @transform_0(%arg0: i32) -> (i32, i32) {
    %c0_i32 = arith.constant 0 : i32
    %c0_i32_0 = arith.constant 0 : i32
    return %arg0, %c0_i32 : i32, i32
  }
  func.func @transform_1(%arg0: i32) -> (i32, i32) {
    %c0_i32 = arith.constant 0 : i32
    %c0_i32_0 = arith.constant 0 : i32
    %c0_i32_1 = arith.constant 0 : i32
    return %c0_i32, %c0_i32_0 : i32, i32
  }
  func.func @transform_2(%arg0: i32) -> (i32, i32) {
    %c0_i32 = arith.constant 0 : i32
    %c0_i32_0 = arith.constant 0 : i32
    %c0_i32_1 = arith.constant 0 : i32
    return %c0_i32, %c0_i32_0 : i32, i32
  }
  func.func @transform_3(%arg0: i32) -> (i32, i32) {
    %c0_i32 = arith.constant 0 : i32
    %c0_i32_0 = arith.constant 0 : i32
    return %arg0, %c0_i32 : i32, i32
  }
}

</mosaic_0001>

<bundles_post_ra>
// kernel: tpu_custom_call.1
= control target key start
LH: loop header
LB: loop body
LE: loop exit
PB: predicated region body
PF: predicated region fallthrough
CT: control target
= control target key end

     0   :  { %8 = vsyncpa [#allocation3], 0  ;;  %s444_s0 = inlined_call_operand.vmem [shape: f32[8,4], index: 0, kind: input, shape index: {}]   ;;  %s445_s1 = inlined_call_operand.vmem [shape: f32[8,128], index: 1, kind: input, shape index: {}]   ;;  %s446_s2 = inlined_call_operand.hbm [shape: f32[128,128], index: 2, kind: input, shape index: {}]   ;;  %s447_s3 = inlined_call_operand.hbm [shape: f32[8,128], index: 3, kind: output, shape index: {}]  }
   0x1   :  { %9 = vsyncpa [#allocation4], 0  ;;  %s367_s12 = smov [#allocation2]   ;;  %s319_s16 = scalar_lea.hbm %s446_s2, 2048 }
   0x2   :  { %s19_s13 = sshll.u32 %s367_s12, 4  ;;  %p320_p0 = scmp.ne.s32.totalorder %s446_s2, %s319_s16  ;;  %s20_s13 = int_to_ptr.vmem [resolvable:$true] %s19_s13 }
   0x3   :  { %p323_p1 = scmp.lt.u32.totalorder %s319_s16, %s446_s2 }
   0x5   :  { %p325_p2 = pnand %p323_p1, %p320_p0 }
   0x7   :  { %328 = shalt.err (!%p325_p2)
}
   0x8   :  { %s329_s21 = scalar_lea.vmem %s20_s13, 2048  ;;  %p334_p4 = scmp.lt.s32.totalorder %s20_s13, %s20_s13 }
   0x9   :  { %p330_p3 = scmp.ne.s32.totalorder %s20_s13, %s329_s21  ;;  %p335_p5 = scmp.lt.s32.totalorder %s329_s21, %s329_s21 }
   0xb   :  { %p336_p6 = por %p335_p5, %p334_p4 }
   0xd   :  { %p337_p7 = pnand %p336_p6, %p330_p3 }
   0xf   :  { %340 = shalt.err (!%p337_p7)
}
  0x10   :  { %s368_s22 = smov 128   ;;  %s369_s23 = smov 8  }
  0x11   :  { %25 = dma.hbm_to_vmem [thread:$0]  %s446_s2, 2048, %s20_s13, [#allocation3], %s368_s22, %s368_s22, %s369_s23  }
  0x12   :  { %363 = dma.done.wait [#allocation3], 2048  }
  0x13   :  { %364 = vsyncadd [#allocation3], 4294965248  ;;  %v370_v0 = vmov 0   ;;  %v371_v1 = vmov 2   ;;  %v372_v2 = vmov 0.0|0.0   ;;  %v29_v3 = vld [vmem:[%s444_s0] sm:$0xff]  ;;  %v184_v61 = vlaneseq }
  0x14   :  { %310 = vset.pattern.permute.xlu0 %v370_v0  ;;  %312 = vset.pattern.permute.xlu1 %v371_v1  ;;  %v81_v4 = vld [vmem:[#allocation2] sm:$0xff]  ;;  %v82_v5 = vld [vmem:[#allocation2 + $0x8] sm:$0xff]  ;;  %v83_v7 = vld [vmem:[#allocation2 + $0x10] sm:$0xff]  ;;  %v373_v12 = vmov 1   ;;  %v374_v13 = vmov 3   ;;  %vm375_vm0 = vmmov 0  }
  0x15   :  { %274 = vmatprep.subr.bf16.mxu0 %v372_v2  ;;  %38 = vperm.xlu0 %310, %v29_v3   ;;  %v275_v6 = vpack.c.bf16 %v82_v5, %v81_v4  ;;  %v84_v8 = vld [vmem:[#allocation2 + $0x18] sm:$0xff]  ;;  %v85_v10 = vld [vmem:[#allocation2 + $0x20] sm:$0xff]  ;;  %v86_v11 = vld [vmem:[#allocation2 + $0x28] sm:$0xff]  ;;  %v376_v21 = vmov 0.0   ;;  %s377_s11 = smov 1   ;;  %v185_v62 = vand.u32 127, %v184_v61 }
  0x16   :  { %60 = vperm.xlu1 %312, %v29_v3   ;;  %v278_v9 = vpack.c.bf16 %v84_v8, %v83_v7  ;;  %v281_v14 = vpack.c.bf16 %v86_v11, %v85_v10  ;;  %v87_v15 = vld [vmem:[#allocation2 + $0x30] sm:$0xff]  ;;  %v88_v16 = vld [vmem:[#allocation2 + $0x38] sm:$0xff]  ;;  %v89_v18 = vld [vmem:[#allocation2 + $0x40] sm:$0xff]  ;;  %271 = vmatprep.mubr.msk.f32.mxu0 %vm375_vm0, %v376_v21 }
  0x17   :  { %276 = vmatpush3.bf16.msra.mxu0 %v275_v6  ;;  %v284_v17 = vpack.c.bf16 %v88_v16, %v87_v15  ;;  %v90_v19 = vld [vmem:[#allocation2 + $0x48] sm:$0xff]  ;;  %v91_v22 = vld [vmem:[#allocation2 + $0x50] sm:$0xff]  ;;  %v92_v23 = vld [vmem:[#allocation2 + $0x58] sm:$0xff]  ;;  %vm187_vm1 = vcmp.eq.s32.totalorder %v185_v62, 1  ;;  %vm186_vm2 = vcmp.eq.s32.totalorder %v185_v62, 0 }
  0x18   :  { %277 = vmatprep.subr.bf16.mxu0 %v372_v2  ;;  %v287_v20 = vpack.c.bf16 %v90_v19, %v89_v18  ;;  %v290_v24 = vpack.c.bf16 %v92_v23, %v91_v22  ;;  %v93_v25 = vld [vmem:[#allocation2 + $0x60] sm:$0xff]  ;;  %v94_v26 = vld [vmem:[#allocation2 + $0x68] sm:$0xff]  ;;  %v95_v28 = vld [vmem:[#allocation2 + $0x70] sm:$0xff] }
  0x19   :  { %311 = vset.pattern.permute.xlu0 %v373_v12  ;;  %v293_v27 = vpack.c.bf16 %v94_v26, %v93_v25  ;;  %v96_v29 = vld [vmem:[#allocation2 + $0x78] sm:$0xff]  ;;  %v217_v31 = vld [vmem:[%s445_s1] ss:$0 sm:$0xff]  ;;  %v216_v35 = vld [vmem:[%s445_s1 + $0x4] ss:$0 sm:$0xff] }
  0x1a   :  { %313 = vset.pattern.permute.xlu1 %v374_v13  ;;  %49 = vperm.xlu0 %311, %v29_v3   ;;  %v296_v30 = vpack.c.bf16 %v96_v29, %v95_v28  ;;  %v218_v36 = vld [vmem:[%s445_s1 + $0x1] ss:$0 sm:$0xff]  ;;  %v219_v37 = vld [vmem:[%s445_s1 + $0x2] ss:$0 sm:$0xff]  ;;  %v220_v39 = vld [vmem:[%s445_s1 + $0x3] ss:$0 sm:$0xff] }
  0x1b   :  { %71 = vperm.xlu1 %313, %v29_v3   ;;  %279 = vmatpush3.bf16.msra.mxu0 %v278_v9  ;;  %v221_v49 = vld [vmem:[%s445_s1 + $0x5] ss:$0 sm:$0xff]  ;;  %s378_s1 = smov [#allocation5]  }
  0x1c   :  { %280 = vmatprep.subr.bf16.mxu0 %v372_v2  ;;  %s207_s12 = sshll.u32 %s378_s1, 4  ;;  %s208_s12 = int_to_ptr.vmem [resolvable:$true] %s207_s12 }
  0x1d   :  { %s341_s13 = scalar_lea.vmem %s208_s12, 128  ;;  %p346_p9 = scmp.lt.s32.totalorder %s208_s12, %s208_s12 }
  0x1e   :  { %p342_p8 = scmp.ne.s32.totalorder %s208_s12, %s341_s13  ;;  %p347_p10 = scmp.lt.s32.totalorder %s341_s13, %s341_s13 }
  0x1f   :  { %314 = vset.pattern.permute.xlu1 %v373_v12  ;;  %282 = vmatpush3.bf16.msra.mxu0 %v281_v14 }
  0x20   :  { %283 = vmatprep.subr.bf16.mxu0 %v372_v2  ;;  %p348_p11 = por %p347_p10, %p346_p9 }
  0x22   :  { %p349_p12 = pnand %p348_p11, %p342_p8 }
  0x23   :  { %285 = vmatpush3.bf16.msra.mxu0 %v284_v17 }
  0x24   :  { %286 = vmatprep.subr.bf16.mxu0 %v372_v2 }
  0x27   :  { %288 = vmatpush3.bf16.msra.mxu0 %v287_v20 }
  0x28   :  { %289 = vmatprep.subr.bf16.mxu0 %v372_v2 }
  0x2b   :  { %291 = vmatpush3.bf16.msra.mxu0 %v290_v24 }
  0x2c   :  { %292 = vmatprep.subr.bf16.mxu0 %v372_v2 }
  0x2f   :  { %294 = vmatpush3.bf16.msra.mxu0 %v293_v27 }
  0x30   :  { %295 = vmatprep.subr.bf16.mxu0 %v372_v2 }
  0x33   :  { %297 = vmatpush3.bf16.msra.mxu0 %v296_v30 }
  0x94   :  { %v39_v32 = vpop.permute.xlu0 %38 }
  0x95   :  { %v61_v33 = vpop.permute.xlu1 %60  ;;  %v45_v34 = vmul.f32 %v217_v31, %v39_v32 }
  0x96   :  { %v67_v43 = vmul.f32 %v219_v37, %v61_v33 }
  0x97   :  { %v46_v41 = vadd.f32 %v216_v35, %v45_v34 }
  0x99   :  { %v50_v38 = vpop.permute.xlu0 %49 }
  0x9a   :  { %v72_v40 = vpop.permute.xlu1 %71  ;;  %v56_v42 = vmul.f32 %v218_v36, %v50_v38 }
  0x9b   :  { %v78_v45 = vmul.f32 %v220_v39, %v72_v40 }
  0x9c   :  { %v57_v44 = vadd.f32 %v56_v42, %v46_v41 }
  0x9e   :  { %v68_v46 = vadd.f32 %v67_v43, %v57_v44 }
  0xa0   :  { %v79_v47 = vadd.f32 %v78_v45, %v68_v46 }
  0xa2   :  { %v80_v48 = vmax.f32 %v79_v47, 0.0 }
  0xa4   :  { %272 = vmatmul.mubr.f32.vlgmr.msra.gmra.mrb[0].mxu0 %v80_v48 }
 0x177   :  { %v168_v50 = vpop.f32.mrb[0].mxu0 }
 0x178   :  { %v169_v51 = vadd.f32 %v221_v49, %v168_v50  ;;  %v273_v52 = vpop.f32.mrb[1].mxu0 }
 0x17a   :  { %173 = vrot.lane.b32.xlu1 %v169_v51, %s377_s11 }
 0x1ec   :  { %v174_v53 = vpop.permute.xlu1 %173 }
 0x1ed   :  { %v176_v54 = vsub.f32 %v169_v51, %v174_v53 }
 0x1ef   :  { %v177_v55 = vsub.f32 0.0, %v176_v54 }
 0x1f1   :  { %v178_v56 = vmul.f32 1.442695, %v177_v55 }
 0x1f3   :  { %315 = vpow2.f32 %v178_v56 }
 0x1fd   :  { %v316_v57 = vpop.eup %315 }
 0x1fe   :  { %v180_v58 = vadd.f32 1.0, %v316_v57 }
 0x200   :  { %317 = vrcp.f32 %v180_v58 }
 0x20a   :  { %v318_v59 = vpop.eup %317 }
 0x20b   :  { %190 = vperm.xlu0 %311, %v318_v59   ;;  %v183_v60 = vsub.f32 1.0, %v318_v59 }
 0x20d   :  { %196 = vperm.xlu1 %314, %v183_v60  }
 0x28a   :  { %v191_v63 = vpop.permute.xlu0 %190 }
 0x28b   :  { %v193_v0 = vsel %vm187_vm1, %v191_v63, %v169_v51 }
 0x28c   :  { %v197_v1 = vpop.permute.xlu1 %196 }
 0x28d   :  { %v199_v2 = vsel %vm186_vm2, %v197_v1, %v193_v0 }
 0x28e   :  { %200 = vst [vmem:[#allocation5] sm:$0xff] %v199_v2 }
 0x28f   :  { %352 = shalt.err (!%p349_p12)
}
 0x290   :  { %s353_s16 = scalar_lea.hbm %s447_s3, 128 }
 0x291   :  { %p354_p13 = scmp.ne.s32.totalorder %s447_s3, %s353_s16  ;;  %p357_p0 = scmp.lt.u32.totalorder %s353_s16, %s447_s3 }
 0x293   :  { %p359_p1 = pnand %p357_p0, %p354_p13 }
 0x295   :  { %362 = shalt.err (!%p359_p1)
}
 0x296   :  { %210 = dma.vmem_to_hbm [thread:$0]  %s208_s12, 128, %s447_s3, [#allocation4]  }
 0x297   :  { %365 = dma.done.wait [#allocation4], 128  }
 0x298   :  { %366 = vsyncadd [#allocation4], 4294967168 }
 0x299   :  { %214 = vsyncpa [#allocation3], 1 }
 0x29a   :  { %215 = vsyncpa [#allocation4], 1 }

</bundles_post_ra>
